<compile_context>
chip_gen: v7x
topology: tpu7x:2x2x1
jax: 0.10.0
libtpu: 0.0.40
codegen_flags: <defaults>
</compile_context>

<pallas_src>
from functools import partial

import jax
import jax.numpy as jnp
import numpy as np
from jax.experimental import pallas as pl
from jax.experimental.pallas import tpu as pltpu


# ----------------------------- kernels --------------------------------------


def _patch_embed_kernel(x_ref, o_ref):
    # x_ref: (1, C, th*W)  input block, channels-major (PyTorch NCHW flattened)
    # o_ref: (1, th*W, C)  output block, channels-last (patch-embedding layout)
    o_ref[0] = jnp.transpose(x_ref[0], (1, 0)).astype(o_ref.dtype)


def _patch_embed_norm_kernel(x_ref, g_ref, b_ref, o_ref, *, eps):
    # Same layout transform, with LayerNorm over the channel (last) dim fused.
    x = x_ref[0].astype(jnp.float32)          # (C, th*W)
    y = jnp.transpose(x, (1, 0))              # (th*W, C)
    mean = jnp.mean(y, axis=-1, keepdims=True)
    cen = y - mean
    var = jnp.mean(cen * cen, axis=-1, keepdims=True)
    y = cen * jax.lax.rsqrt(var + eps)
    # gamma/beta loaded & cast once per block (hoisted, no per-element recast)
    y = y * g_ref[...].astype(jnp.float32) + b_ref[...].astype(jnp.float32)
    o_ref[0] = y.astype(o_ref.dtype)


# ----------------------------- wrapper ---------------------------------------


_VMEM_BUDGET_BYTES = 8 * 1024 * 1024  # double-buffered in+out blocks, v5e-safe


def _pick_row_tile(H, W, C, itemsize):
    """Largest divisor of H whose (th*W, C) in/out blocks (double-buffered)
    fit a conservative VMEM budget and satisfy the sublane rule th*W % 8 == 0."""
    work_itemsize = max(itemsize, 4)  # norm path holds f32 intermediates
    per_row = 4 * W * C * work_itemsize  # 2 bufs * (in + out) per row of H
    divisors = [d for d in range(1, H + 1) if H % d == 0 and (d * W) % 8 == 0]
    if not divisors:
        return H  # caller's assert will report the unsupported shape clearly
    fitting = [d for d in divisors if d * per_row <= _VMEM_BUDGET_BYTES]
    return max(fitting) if fitting else min(divisors)


def patch_embed(x, T, gamma=None, beta=None, eps=1e-5, row_tile=None):
    """PatchEmbed.forward.

    x: (b*T, C, H, W)  (PyTorch NCHW layout)
    returns: (b, T*H*W, C), optionally LayerNorm'ed over C (embed_dim).
    """
    bt, C, H, W = x.shape
    assert bt % T == 0, "batch dim must be divisible by T"
    b = bt // T

    th = row_tile if row_tile is not None else _pick_row_tile(H, W, C, x.dtype.itemsize)
    assert H % th == 0, f"row tile {th} must divide H={H}"
    thw = th * W
    assert thw % 8 == 0, "row-block * W must be a multiple of 8 (sublane rule)"
    n_hblk = H // th

    # Free, contiguous reshape: (bt, C, H, W) -> (bt, C, H*W); no extra HBM
    # copy of the input is made.
    x2 = x.reshape(bt, C, H * W)

    in_specs = [
        pl.BlockSpec((1, C, thw), lambda i, j, h: (i * T + j, 0, h)),
    ]
    args = [x2]
    if gamma is not None:
        kernel = partial(_patch_embed_norm_kernel, eps=eps)
        in_specs += [
            pl.BlockSpec((1, C), lambda i, j, h: (0, 0)),
            pl.BlockSpec((1, C), lambda i, j, h: (0, 0)),
        ]
        args += [gamma.reshape(1, C), beta.reshape(1, C)]
    else:
        kernel = _patch_embed_kernel

    out = pl.pallas_call(
        kernel,
        out_shape=jax.ShapeDtypeStruct((b, T * H * W, C), x.dtype),
        grid_spec=pltpu.PrefetchScalarGridSpec(
            num_scalar_prefetch=0,
            grid=(b, T, n_hblk),
            in_specs=in_specs,
            out_specs=pl.BlockSpec(
                (1, thw, C), lambda i, j, h: (i, j * n_hblk + h, 0)
            ),
        ),
        compiler_params=pltpu.CompilerParams(
            # no reduction axis: everything is independent -> megacore-shardable
            dimension_semantics=("parallel", "parallel", "parallel"),
        ),
    )(*args)
    return out


# ----------------------------- reference & test ------------------------------


def _reference(x, T, gamma=None, beta=None, eps=1e-5):
    bt, C, H, W = x.shape
    b = bt // T
    y = x.reshape(b, T, C, H, W)
    y = jnp.transpose(y, (0, 1, 3, 4, 2)).reshape(b, T * H * W, C)
    if gamma is not None:
        mean = jnp.mean(y, axis=-1, keepdims=True)
        var = jnp.mean((y - mean) ** 2, axis=-1, keepdims=True)
        y = (y - mean) / jnp.sqrt(var + eps) * gamma + beta
    return y


if __name__ == "__main__":
    T, b, C, H, W = 5, 2, 4, 16, 16          # bt = b*T = 10 frames
    key = jax.random.PRNGKey(0)
    kx, kg, kb = jax.random.split(key, 3)

    x = jax.random.normal(kx, (b * T, C, H, W), dtype=jnp.float32)

    # Default module config: norm_layer=None -> pure permute/reshape.
    out = jax.block_until_ready(patch_embed(x, T))
    ref = jax.block_until_ready(_reference(x, T))
    np.testing.assert_allclose(np.asarray(out), np.asarray(ref), rtol=1e-6, atol=1e-6)

    # Optional norm_layer=nn.LayerNorm(embed_dim) path, fused inside the kernel.
    gamma = jax.random.normal(kg, (C,), dtype=jnp.float32)
    beta = jax.random.normal(kb, (C,), dtype=jnp.float32)
    out_n = jax.block_until_ready(patch_embed(x, T, gamma, beta))
    ref_n = jax.block_until_ready(_reference(x, T, gamma, beta))
    np.testing.assert_allclose(np.asarray(out_n), np.asarray(ref_n), rtol=1e-5, atol=1e-5)

    print("KERNEL_OK")
</pallas_src>

<mosaic_0001>
module attributes {stable_mosaic.version = 11 : i64} {
  func.func @_patch_embed_kernel(%arg0: i32, %arg1: i32, %arg2: i32, %arg3: memref<1x4x256xf32, #tpu.memory_space<vmem>>, %arg4: memref<1x256x4xf32, #tpu.memory_space<vmem>>) attributes {dimension_semantics = [#tpu.dimension_semantics<parallel>, #tpu.dimension_semantics<parallel>, #tpu.dimension_semantics<parallel>], iteration_bounds = array<i64: 2, 5, 1>, scalar_prefetch = 0 : i64, scratch_operands = 0 : i64, tpu.core_type = #tpu.core_type<tc>, window_params = [{transform_indices = @transform_0, window_bounds = array<i64: 1, 4, 256>}, {transform_indices = @transform_1, window_bounds = array<i64: 1, 256, 4>}]} {
    %c0 = arith.constant 0 : index
    %c0_0 = arith.constant 0 : index
    %c0_1 = arith.constant 0 : index
    %0 = vector.load %arg3[%c0, %c0_0, %c0_1] : memref<1x4x256xf32, #tpu.memory_space<vmem>>, vector<1x4x256xf32>
    %1 = vector.shape_cast %0 : vector<1x4x256xf32> to vector<4x256xf32>
    %2 = tpu.transpose %1, [1, 0] : vector<4x256xf32> -> vector<256x4xf32>
    %c0_2 = arith.constant 0 : index
    %c0_3 = arith.constant 0 : index
    %c0_4 = arith.constant 0 : index
    %3 = vector.load %arg4[%c0_2, %c0_3, %c0_4] : memref<1x256x4xf32, #tpu.memory_space<vmem>>, vector<1x256x4xf32>
    %4 = vector.shape_cast %3 : vector<1x256x4xf32> to vector<256x4xf32>
    %5 = vector.shape_cast %2 : vector<256x4xf32> to vector<1x256x4xf32>
    tpu.vector_store %arg4[%c0_2, %c0_3, %c0_4], %5 {strides = array<i32>} : memref<1x256x4xf32, #tpu.memory_space<vmem>>, vector<1x256x4xf32>,
    return
  }
  func.func @transform_0(%arg0: i32, %arg1: i32, %arg2: i32) -> (i32, i32, i32) {
    %c5_i32 = arith.constant 5 : i32
    %0 = arith.muli %arg0, %c5_i32 : i32
    %1 = arith.addi %0, %arg1 : i32
    %c0_i32 = arith.constant 0 : i32
    %c0_i32_0 = arith.constant 0 : i32
    return %1, %c0_i32, %arg2 : i32, i32, i32
  }
  func.func @transform_1(%arg0: i32, %arg1: i32, %arg2: i32) -> (i32, i32, i32) {
    %c1_i32 = arith.constant 1 : i32
    %0 = arith.muli %arg1, %c1_i32 : i32
    %1 = arith.addi %0, %arg2 : i32
    %c0_i32 = arith.constant 0 : i32
    %c0_i32_0 = arith.constant 0 : i32
    return %arg0, %1, %c0_i32 : i32, i32, i32
  }
}

</mosaic_0001>

<bundles_post_ra>
// kernel: tpu_custom_call.1
= control target key start
LH: loop header
LB: loop body
LE: loop exit
PB: predicated region body
PF: predicated region fallthrough
CT: control target
= control target key end

     0   :  { %6 = vsyncpa [#allocation3], 0  ;;  %s800_s0 = inlined_call_operand.hbm [shape: f32[10,4,256], index: 0, kind: input, shape index: {}]   ;;  %s801_s1 = inlined_call_operand.vmem [shape: f32[2,1280,4], index: 1, kind: output, shape index: {}]  }
   0x1   :  { %8 = vsyncpa [#allocation3 + $0x1], 0  ;;  %s587_s6 = smov 0   ;;  %s589_s7 = smov 0  }
   0x2   :  { %s591_s8 = smov 0   ;;  %s593_s9 = smov 0  }
   0x3   :  { %s595_s10 = smov 0   ;;  %s597_s11 = smov 0  }
   0x4   :  { %s599_s12 = smov 0   ;;  %s601_s13 = smov 0  }
   0x5 LB: > { %s390_s14 = sadd.s32 4294967295, %s574_s13   ;;  %s29_s15 = sadd.s32 1, %s566_s11  ;;  %s574_s13 = sphi %s601_s13, %s14_s13   ;;  %s570_s12 = sphi %s599_s12, %s813_s12   ;;  %s566_s11 = sphi %s597_s11, %s812_s11   ;;  %s562_s10 = sphi %s595_s10, %s811_s10   ;;  %s558_s9 = sphi %s593_s9, %s810_s9   ;;  %s554_s8 = sphi %s591_s8, %s809_s8   ;;  %s550_s7 = sphi %s589_s7, %s808_s7   ;;  %s546_s6 = sphi %s587_s6, %s807_s6  }
   0x6   : > { %p31_p0 = scmp.ge.s32.totalorder %s29_s15, 5  ;;  %s33_s16 = sadd.s32 1, %s570_s12 }
   0x7   : > { %s37_s17 = smul.u32 5, %s570_s12  ;;  %s46_s18 = sadd.s32 1, %s554_s8 }
   0x8   : > { %s815_s15 = smov (%p31_p0, %s29_s15), 0  ;;  %s817_s16 = smov (!%p31_p0, %s33_s16), %s570_s12 }
   0x9   : > { %s38_s19 = sadd.s32 %s566_s11, %s37_s17  ;;  %p53_p1 = scmp.ne.s32.totalorder %s554_s8, %s550_s7 }
   0xa   : > { %p35_p2 = scmp.ge.s32.totalorder %s817_s16, 2  ;;  %p54_p3 = scmp.eq.s32.totalorder %s574_s13, 0 }
   0xb   : > { %p59_p4 = scmp.ne.s32.totalorder %s550_s7, %s546_s6  ;;  %p60_p5 = scmp.eq.s32.totalorder %s390_s14, 0 }
   0xc   : > { %s819_s16 = smov (%p35_p2, %s817_s16), 0  ;;  %p640_p6 = por %p54_p3, %p53_p1 }
   0xd   : > { %p644_p7 = por %p60_p5, %p59_p4  ;;  %s39_s22 = smul.u32 5, %s819_s16 }
   0xe   : > { %p411_p8 = scmp.lt.s32.totalorder %s574_s13, 10  ;;  %s113_s23 = sand.u32 1, %s554_s8  }
   0xf   : > { %s40_s24 = sadd.s32 %s39_s22, %s815_s15  ;;  %s394_s26 = sshll.u32 %s113_s23, 3 }
  0x10   : > { %s41_s25 = ssub.s32 %s38_s19, %s40_s24  ;;  %s403_s27 = sshll.u32 %s38_s19, 7 }
  0x11   : > { %p44_p9 = scmp.eq.s32.totalorder %s41_s25, 0  ;;  %s117_s28 = scalar_lea.vmem [#allocation2], %s394_s26 }
  0x12   : > { %s129_s29 = sshll.u32 %s117_s28, 4  ;;  %s658_s4 = scalar_lea.hbm %s800_s0, %s403_s27  ;;  %s660_s29 = int_to_ptr.vmem [resolvable:$true] %s129_s29 }
  0x13   : > { %s653_s30 = scalar_select %p44_p9, %s554_s8, %s46_s18  }
  0x14   : > { %p664_p10 = pnand %p411_p8, %p640_p6  ;;  %s114_s6 = scalar_lea.sflag [#allocation3], %s113_s23 }
  0x15   : > { %s478_s14 = scalar_lea.hbm %s658_s4, 128  ;;  %s483_s19 = scalar_lea.hbm %s800_s0, 1280 }
  0x16   : > { %p479_p13 = scmp.ne.s32.totalorder %s658_s4, %s478_s14  ;;  %p480_p0 = pneg %p664_p10 }
  0x17   : > { %p484_p3 = scmp.lt.u32.totalorder %s658_s4, %s800_s0  ;;  %p485_p4 = scmp.lt.u32.totalorder %s483_s19, %s478_s14 }
  0x18   : > { %p481_p1 = pnand %p480_p0, %p479_p13  ;;  %p487_p6 = scmp.lt.u32.totalorder %s478_s14, %s658_s4 }
  0x19   : > { %p486_p5 = por %p485_p4, %p484_p3 }
  0x1a   : > { %p482_p2 = pneg %p481_p1 }
  0x1b   : > { %p488_p8 = por %p487_p6, %p486_p5 }
  0x1d   : > { %p489_p9 = pnand %p488_p8, %p482_p2 }
  0x1f   : > { %492 = shalt.err (!%p489_p9)
}
  0x20   : > { %s493_s23 = scalar_lea.vmem %s660_s29, 128  ;;  %s576_s24 = smov [#allocation2]  }
  0x21   : > { %p494_p13 = scmp.ne.s32.totalorder %s660_s29, %s493_s23  ;;  %s498_s25 = sshll.u32 %s576_s24, 4  ;;  %s499_s25 = int_to_ptr.vmem [resolvable:$false] %s498_s25 }
  0x22   : > { %s500_s26 = scalar_lea.vmem %s499_s25, 256  ;;  %p501_p12 = scmp.lt.s32.totalorder %s660_s29, %s499_s25 }
  0x23   : > { %p496_p1 = pnand %p494_p13, %p480_p0  ;;  %p502_p3 = scmp.lt.s32.totalorder %s500_s26, %s493_s23 }
  0x25   : > { %p497_p11 = pneg %p496_p1  ;;  %p503_p4 = por %p502_p3, %p501_p12 }
  0x27   : > { %p504_p5 = pnand %p503_p4, %p497_p11 }
  0x29   : > { %507 = shalt.err (!%p504_p5)
}
  0x2a   : > { %410 = dma.hbm_to_vmem [thread:$0]  (!%p664_p10), %s658_s4, 128, %s660_s29, %s114_s6  }
  0x2b   : > { %p805_p2 = scmp.lt.s32.totalorder %s574_s13, 11  ;;  %p806_p6 = scmp.ge.s32.totalorder %s574_s13, 1 }
  0x2d   : > { %p135_p0 = pnand %p806_p6, %p805_p2 }
  0x2e   : > { %s140_s27 = sand.u32 (!%p135_p0), 1, %s550_s7  }
  0x2f   : > { %138 = sbr.rel (%p135_p0) target bundleno = 310 (0x136), region = 24  ;;  %s398_s28 = sshll.u32 (!%p135_p0), %s140_s27, 3 }
  0x30   : > { %s141_s2 = scalar_lea.sflag (!%p135_p0), [#allocation3], %s140_s27  ;;  %s144_s3 = scalar_lea.vmem (!%p135_p0), [#allocation2], %s398_s28 }
  0x36   : > { %541 = dma.done.wait (%p644_p7), %s141_s2, 128  }
  0x37   : > { %543 = vsyncadd (%p644_p7), %s141_s2, 4294967168  ;;  %v183_v0 = vld [vmem:[%s144_s3] sm:$0xff]  ;;  %s399_s29 = sshll.u32 %s558_s9, 5  ;;  %p173_p10 = scmp.lt.s32.totalorder %s562_s10, 1  ;;  %vm251_vm0 = vcmask 31744  }
  0x38   : > { %187 = vxpose.xlu0.b32.start.end [1/1] (short) %v183_v0, 128  ;;  %v185_v1 = vcombine.high %v183_v0, %v183_v0  ;;  %p175_p11 = scmp.lt.s32.totalorder %s399_s29, 159 }
  0x39   : > { %s821_s10 = smov (!%p173_p10, %s562_s10), 1 }
  0x3a   : > { %s823_s29 = smov (!%p175_p11, %s399_s29), 159  ;;  %s404_s4 = smul.u32 160, %s821_s10 }
  0x3c   : > { %s178_s5 = sadd.s32 %s404_s4, %s823_s29 }
  0x3d   : > { %s400_s6 = sshll.u32 %s178_s5, 3 }
  0x3e   : > { %s710_s21 = scalar_lea.vmem %s801_s1, %s400_s6 }
  0x75   : > { %219 = vxpose.xlu0.b32.start.end [1/1] (short) %v185_v1, 128 }
  0xb8   : > { %v203_v2 = vpop.trf.xlu0 }
  0xb9   : > { %252 = vst.msk [vmem:[%s710_s21] sm:$0xff] %vm251_vm0, %v203_v2 }
  0xbc   : > { %v204_v3 = vpop.trf.xlu0 }
  0xbd   : > { %253 = vst.msk [vmem:[%s710_s21 + $0x8] sm:$0xff] %vm251_vm0, %v204_v3 }
  0xc0   : > { %v205_v4 = vpop.trf.xlu0 }
  0xc1   : > { %254 = vst.msk [vmem:[%s710_s21 + $0x10] sm:$0xff] %vm251_vm0, %v205_v4 }
  0xc4   : > { %v206_v5 = vpop.trf.xlu0 }
  0xc5   : > { %255 = vst.msk [vmem:[%s710_s21 + $0x18] sm:$0xff] %vm251_vm0, %v206_v5 }
  0xc8   : > { %v207_v6 = vpop.trf.xlu0 }
  0xc9   : > { %256 = vst.msk [vmem:[%s710_s21 + $0x20] sm:$0xff] %vm251_vm0, %v207_v6 }
  0xcc   : > { %v208_v7 = vpop.trf.xlu0 }
  0xcd   : > { %257 = vst.msk [vmem:[%s710_s21 + $0x28] sm:$0xff] %vm251_vm0, %v208_v7 }
  0xd0   : > { %v209_v8 = vpop.trf.xlu0 }
  0xd1   : > { %258 = vst.msk [vmem:[%s710_s21 + $0x30] sm:$0xff] %vm251_vm0, %v209_v8 }
  0xd4   : > { %v210_v9 = vpop.trf.xlu0 }
  0xd5   : > { %259 = vst.msk [vmem:[%s710_s21 + $0x38] sm:$0xff] %vm251_vm0, %v210_v9 }
  0xd8   : > { %v211_v10 = vpop.trf.xlu0 }
  0xd9   : > { %260 = vst.msk [vmem:[%s710_s21 + $0x40] sm:$0xff] %vm251_vm0, %v211_v10 }
  0xdc   : > { %v212_v11 = vpop.trf.xlu0 }
  0xdd   : > { %261 = vst.msk [vmem:[%s710_s21 + $0x48] sm:$0xff] %vm251_vm0, %v212_v11 }
  0xe0   : > { %v213_v12 = vpop.trf.xlu0 }
  0xe1   : > { %262 = vst.msk [vmem:[%s710_s21 + $0x50] sm:$0xff] %vm251_vm0, %v213_v12 }
  0xe4   : > { %v214_v13 = vpop.trf.xlu0 }
  0xe5   : > { %263 = vst.msk [vmem:[%s710_s21 + $0x58] sm:$0xff] %vm251_vm0, %v214_v13 }
  0xe8   : > { %v215_v14 = vpop.trf.xlu0 }
  0xe9   : > { %264 = vst.msk [vmem:[%s710_s21 + $0x60] sm:$0xff] %vm251_vm0, %v215_v14 }
  0xec   : > { %v216_v15 = vpop.trf.xlu0 }
  0xed   : > { %265 = vst.msk [vmem:[%s710_s21 + $0x68] sm:$0xff] %vm251_vm0, %v216_v15 }
  0xf0   : > { %v217_v16 = vpop.trf.xlu0 }
  0xf1   : > { %266 = vst.msk [vmem:[%s710_s21 + $0x70] sm:$0xff] %vm251_vm0, %v217_v16 }
  0xf4   : > { %v218_v17 = vpop.trf.xlu0 }
  0xf5   : > { %267 = vst.msk [vmem:[%s710_s21 + $0x78] sm:$0xff] %vm251_vm0, %v218_v17 }
  0xf8   : > { %v235_v18 = vpop.trf.xlu0 }
  0xf9   : > { %268 = vst.msk [vmem:[%s710_s21 + $0x80] sm:$0xff] %vm251_vm0, %v235_v18 }
  0xfc   : > { %v236_v19 = vpop.trf.xlu0 }
  0xfd   : > { %269 = vst.msk [vmem:[%s710_s21 + $0x88] sm:$0xff] %vm251_vm0, %v236_v19 }
 0x100   : > { %v237_v20 = vpop.trf.xlu0 }
 0x101   : > { %270 = vst.msk [vmem:[%s710_s21 + $0x90] sm:$0xff] %vm251_vm0, %v237_v20 }
 0x104   : > { %v238_v21 = vpop.trf.xlu0 }
 0x105   : > { %271 = vst.msk [vmem:[%s710_s21 + $0x98] sm:$0xff] %vm251_vm0, %v238_v21 }
 0x108   : > { %v239_v22 = vpop.trf.xlu0 }
 0x109   : > { %272 = vst.msk [vmem:[%s710_s21 + $0xa0] sm:$0xff] %vm251_vm0, %v239_v22 }
 0x10c   : > { %v240_v23 = vpop.trf.xlu0 }
 0x10d   : > { %273 = vst.msk [vmem:[%s710_s21 + $0xa8] sm:$0xff] %vm251_vm0, %v240_v23 }
 0x110   : > { %v241_v24 = vpop.trf.xlu0 }
 0x111   : > { %274 = vst.msk [vmem:[%s710_s21 + $0xb0] sm:$0xff] %vm251_vm0, %v241_v24 }
 0x114   : > { %v242_v25 = vpop.trf.xlu0 }
 0x115   : > { %275 = vst.msk [vmem:[%s710_s21 + $0xb8] sm:$0xff] %vm251_vm0, %v242_v25 }
 0x118   : > { %v243_v26 = vpop.trf.xlu0 }
 0x119   : > { %276 = vst.msk [vmem:[%s710_s21 + $0xc0] sm:$0xff] %vm251_vm0, %v243_v26 }
 0x11c   : > { %v244_v27 = vpop.trf.xlu0 }
 0x11d   : > { %277 = vst.msk [vmem:[%s710_s21 + $0xc8] sm:$0xff] %vm251_vm0, %v244_v27 }
 0x120   : > { %v245_v28 = vpop.trf.xlu0 }
 0x121   : > { %278 = vst.msk [vmem:[%s710_s21 + $0xd0] sm:$0xff] %vm251_vm0, %v245_v28 }
 0x124   : > { %v246_v29 = vpop.trf.xlu0 }
 0x125   : > { %279 = vst.msk [vmem:[%s710_s21 + $0xd8] sm:$0xff] %vm251_vm0, %v246_v29 }
 0x128   : > { %v247_v30 = vpop.trf.xlu0 }
 0x129   : > { %280 = vst.msk [vmem:[%s710_s21 + $0xe0] sm:$0xff] %vm251_vm0, %v247_v30 }
 0x12c   : > { %v248_v31 = vpop.trf.xlu0 }
 0x12d   : > { %281 = vst.msk [vmem:[%s710_s21 + $0xe8] sm:$0xff] %vm251_vm0, %v248_v31 }
 0x130   : > { %v249_v32 = vpop.trf.xlu0 }
 0x131   : > { %282 = vst.msk [vmem:[%s710_s21 + $0xf0] sm:$0xff] %vm251_vm0, %v249_v32 }
 0x134   : > { %v250_v33 = vpop.trf.xlu0 }
 0x135   : > { %283 = vst.msk [vmem:[%s710_s21 + $0xf8] sm:$0xff] %vm251_vm0, %v250_v33 }
 0x136 PF: > { %s14_s13 = sadd.s32 1, %s574_s13   ;;  %s807_s6 = smov %s550_s7 }
 0x137   : > { %p11_p7 = scmp.ge.s32.totalorder %s14_s13, 12   ;;  %s808_s7 = smov %s554_s8 }
 0x138   : > { %s809_s8 = smov %s653_s30  ;;  %s810_s9 = smov %s566_s11 }
 0x139   : > { %s811_s10 = smov %s570_s12  ;;  %s812_s11 = smov %s815_s15 }
 0x13a   : > { %s813_s12 = smov %s819_s16  ;;  %13 = sbr.rel (!%p11_p7) target bundleno = 5 (0x5), region = 64 }
 0x141   :  { %317 = vsyncpa [#allocation3], 1 }
 0x142   :  { %319 = vsyncpa [#allocation3 + $0x1], 1 }

</bundles_post_ra>
